<compile_context>
chip_gen: v5e
topology: v5e:2x2
jax: 0.10.0
libtpu: 0.0.40
codegen_flags: <defaults>
</compile_context>

<pallas_src>
import jax
import jax.numpy as jnp
from jax.experimental import pallas as pl
from jax.experimental.pallas import tpu as pltpu

MASK = -1.0


def _round_up(x, m):
    return (x + m - 1) // m * m


def tha_kernel(imgs_ref, capsT_ref, wvalid_ref, rvalid_ref, out_ref):
    # imgs_ref  : (TM, D)      bf16   TM = TI * R_p rows (image-region rows)
    # capsT_ref : (D, TC*W)    bf16   word-major columns for TC captions
    # wvalid_ref: (W, TC)      f32    1.0 where word w of caption c is valid
    # rvalid_ref: (TM, 1)      f32    1.0 where the region row is valid
    # out_ref   : (TM, TC)     f32
    TM, TC = out_ref.shape
    W = wvalid_ref.shape[0]

    # Single fused MXU matmul, f32 accumulation.
    s = jnp.dot(imgs_ref[...], capsT_ref[...],
                preferred_element_type=jnp.float32)          # (TM, TC*W)

    wv = wvalid_ref[...]                                     # (W, TC), loaded once

    # Max over words: W aligned, contiguous 128-lane slices.
    # Word mask (-> MASK) is applied per word-slice BEFORE the max (matches
    # the reference masked_fill semantics).
    m = jnp.where(wv[0:1, :] > 0.0, s[:, 0:TC], MASK)        # word 0
    for w in range(1, W):                                    # static unroll (W = max_w)
        s_w = s[:, w * TC:(w + 1) * TC]                      # aligned lane slice
        m = jnp.maximum(m, jnp.where(wv[w:w + 1, :] > 0.0, s_w, MASK))

    # Region-length mask applied once on the reduced result, then a single
    # lane-dense (TC = 128) store.
    out_ref[...] = jnp.where(rvalid_ref[...] > 0.0, m, MASK)


def tha_coding(imgs, caps, img_lens, cap_lens, *, max_r=None, max_w=None):
    """Pallas implementation of THACoding.forward.

    max_r / max_w can be passed as static Python ints to avoid the host sync
    implied by int(jnp.max(...)) (needed because kernel shapes are static).
    """
    if max_r is None:
        max_r = int(jnp.max(img_lens))   # host sync; pass explicitly under jit
    if max_w is None:
        max_w = int(jnp.max(cap_lens))

    imgs = imgs[:, :max_r, :]
    caps = caps[:, :max_w, :]
    n_img, R, D = imgs.shape
    n_cap, W, _ = caps.shape
    img_lens = img_lens.astype(jnp.int32)
    cap_lens = cap_lens.astype(jnp.int32)

    # ---- tiling parameters --------------------------------------------------
    R_p = _round_up(R, 8)                       # sublane-align regions
    TC = 128                                    # caption tile -> lane-dense stores
    C_p = _round_up(n_cap, TC)
    TI = max(1, min(pl.cdiv(256, R_p), n_img))  # images per step so M ~ 256
    n_img_p = _round_up(n_img, TI)
    TM = TI * R_p
    TN = TC * W

    # ---- pad + lay out operands (bf16 for the MXU) --------------------------
    imgs_p = jnp.zeros((n_img_p, R_p, D), jnp.bfloat16)
    imgs_p = imgs_p.at[:n_img, :R, :].set(imgs.astype(jnp.bfloat16))
    imgs2d = imgs_p.reshape(n_img_p * R_p, D)

    caps_p = jnp.zeros((C_p, W, D), jnp.bfloat16)
    caps_p = caps_p.at[:n_cap, :, :].set(caps.astype(jnp.bfloat16))
    # Pre-transposed RHS (contraction dim first): column layout is
    # caption-tile-major, word-major within a tile:
    #   capsT[d, j*(TC*W) + w*TC + c_local] = caps[j*TC + c_local, w, d]
    capsT = (caps_p.reshape(C_p // TC, TC, W, D)
             .transpose(3, 0, 2, 1)
             .reshape(D, C_p * W))

    cap_lens_p = jnp.zeros((C_p,), jnp.int32).at[:n_cap].set(cap_lens)
    wvalid = (jnp.arange(W, dtype=jnp.int32)[:, None]
              < cap_lens_p[None, :]).astype(jnp.float32)        # (W, C_p)

    img_lens_p = jnp.zeros((n_img_p,), jnp.int32).at[:n_img].set(img_lens)
    rvalid = (jnp.arange(R_p, dtype=jnp.int32)[None, :]
              < img_lens_p[:, None]).astype(jnp.float32)        # (n_img_p, R_p)
    rvalid = rvalid.reshape(n_img_p * R_p, 1)

    grid = (n_img_p // TI, C_p // TC)

    out2d = pl.pallas_call(
        tha_kernel,
        out_shape=jax.ShapeDtypeStruct((n_img_p * R_p, C_p), jnp.float32),
        grid=grid,
        in_specs=[
            pl.BlockSpec((TM, D), lambda i, j: (i, 0)),    # image-region rows
            pl.BlockSpec((D, TN), lambda i, j: (0, j)),    # caption tile (transposed)
            pl.BlockSpec((W, TC), lambda i, j: (0, j)),    # word-validity mask
            pl.BlockSpec((TM, 1), lambda i, j: (i, 0)),    # row-validity mask
        ],
        out_specs=pl.BlockSpec((TM, TC), lambda i, j: (i, j)),
        compiler_params=pltpu.CompilerParams(
            dimension_semantics=("parallel", "parallel"),
            vmem_limit_bytes=48 * 1024 * 1024,
        ),
    )(imgs2d, capsT, wvalid, rvalid)

    # Undo padding / layout: (n_img_p*R_p, C_p) -> (n_img, n_cap, max_r)
    out = out2d[: n_img * R_p].reshape(n_img, R_p, C_p)[:, :max_r, :n_cap]
    return jnp.transpose(out, (0, 2, 1))


def tha_coding_reference(imgs, caps, img_lens, cap_lens):
    # Pure-JAX reference mirroring the PyTorch forward.
    max_r = int(jnp.max(img_lens))
    max_w = int(jnp.max(cap_lens))
    sims = jnp.einsum("ird,cwd->icrw", imgs, caps)[:, :, :max_r, :max_w]
    r_mask = jnp.arange(max_r)[None, :] < img_lens[:, None]
    w_mask = jnp.arange(max_w)[None, :] < cap_lens[:, None]
    mask = r_mask[:, None, :, None] & w_mask[None, :, None, :]
    sims = jnp.where(mask, sims, jnp.float32(MASK))
    return jnp.max(sims, axis=-1)


if __name__ == "__main__":
    key = jax.random.PRNGKey(0)
    k_img, k_cap = jax.random.split(key)

    n_img, n_region, n_cap, n_word, d = 2, 16, 3, 8, 32
    imgs = jax.random.normal(k_img, (n_img, n_region, d), dtype=jnp.float32)
    caps = jax.random.normal(k_cap, (n_cap, n_word, d), dtype=jnp.float32)
    img_lens = jnp.array([16, 11], dtype=jnp.int32)   # max == n_region
    cap_lens = jnp.array([8, 5, 7], dtype=jnp.int32)  # max == n_word

    out = tha_coding(imgs, caps, img_lens, cap_lens)
    out = jax.block_until_ready(out)

    # Reference on bf16-rounded inputs (kernel feeds bf16 to the MXU, f32 accumulate).
    imgs_r = imgs.astype(jnp.bfloat16).astype(jnp.float32)
    caps_r = caps.astype(jnp.bfloat16).astype(jnp.float32)
    ref = tha_coding_reference(imgs_r, caps_r, img_lens, cap_lens)

    assert out.shape == ref.shape == (n_img, n_cap, int(img_lens.max()))
    assert jnp.allclose(out, ref, atol=1e-2, rtol=1e-2), "mismatch vs reference"

    print("KERNEL_OK")
</pallas_src>

<mosaic_0001>
module attributes {stable_mosaic.version = 11 : i64} {
  func.func @tha_kernel(%arg0: i32, %arg1: i32, %arg2: memref<32x32xbf16, #tpu.memory_space<vmem>>, %arg3: memref<32x1024xbf16, #tpu.memory_space<vmem>>, %arg4: memref<8x128xf32, #tpu.memory_space<vmem>>, %arg5: memref<32x1xf32, #tpu.memory_space<vmem>>, %arg6: memref<32x128xf32, #tpu.memory_space<vmem>>) attributes {dimension_semantics = [#tpu.dimension_semantics<parallel>, #tpu.dimension_semantics<parallel>], iteration_bounds = array<i64: 1, 1>, scalar_prefetch = 0 : i64, scratch_operands = 0 : i64, tpu.core_type = #tpu.core_type<tc>, window_params = [{transform_indices = @transform_0, window_bounds = array<i64: 32, 32>}, {transform_indices = @transform_1, window_bounds = array<i64: 32, 1024>}, {transform_indices = @transform_2, window_bounds = array<i64: 8, 128>}, {transform_indices = @transform_3, window_bounds = array<i64: 32, 1>}, {transform_indices = @transform_4, window_bounds = array<i64: 32, 128>}]} {
    %c0 = arith.constant 0 : index
    %c0_0 = arith.constant 0 : index
    %0 = vector.load %arg2[%c0, %c0_0] : memref<32x32xbf16, #tpu.memory_space<vmem>>, vector<32x32xbf16>
    %c0_1 = arith.constant 0 : index
    %c0_2 = arith.constant 0 : index
    %1 = vector.load %arg3[%c0_1, %c0_2] : memref<32x1024xbf16, #tpu.memory_space<vmem>>, vector<32x1024xbf16>
    %cst = arith.constant dense<0.000000e+00> : vector<32x1024xf32>
    %2 = tpu.matmul %0, %1, %cst {dimension_numbers = #tpu.dot_dimension_numbers<[1], [0], [0], [1], [0, 0, 1, 1], [], []>} : vector<32x32xbf16>, vector<32x1024xbf16>, vector<32x1024xf32> -> vector<32x1024xf32>
    %c0_3 = arith.constant 0 : index
    %c0_4 = arith.constant 0 : index
    %3 = vector.load %arg4[%c0_3, %c0_4] : memref<8x128xf32, #tpu.memory_space<vmem>>, vector<8x128xf32>
    %4 = vector.extract_strided_slice %3 {offsets = [0, 0], sizes = [1, 128], strides = [1, 1]} : vector<8x128xf32> to vector<1x128xf32>
    %cst_5 = arith.constant 0.000000e+00 : f32
    %5 = vector.broadcast %cst_5 : f32 to vector<1x128xf32>
    %6 = arith.cmpf ogt, %4, %5 : vector<1x128xf32>
    %7 = vector.extract_strided_slice %2 {offsets = [0, 0], sizes = [32, 128], strides = [1, 1]} : vector<32x1024xf32> to vector<32x128xf32>
    %cst_6 = arith.constant -1.000000e+00 : f32
    %8 = vector.shape_cast %6 : vector<1x128xi1> to vector<1x128xi1>
    %9 = vector.broadcast %8 : vector<1x128xi1> to vector<32x128xi1>
    %10 = vector.broadcast %cst_6 : f32 to vector<32x128xf32>
    %11 = arith.select %9, %7, %10 : vector<32x128xi1>, vector<32x128xf32>
    %12 = vector.extract_strided_slice %2 {offsets = [0, 128], sizes = [32, 128], strides = [1, 1]} : vector<32x1024xf32> to vector<32x128xf32>
    %13 = vector.extract_strided_slice %3 {offsets = [1, 0], sizes = [1, 128], strides = [1, 1]} : vector<8x128xf32> to vector<1x128xf32>
    %cst_7 = arith.constant 0.000000e+00 : f32
    %14 = vector.broadcast %cst_7 : f32 to vector<1x128xf32>
    %15 = arith.cmpf ogt, %13, %14 : vector<1x128xf32>
    %cst_8 = arith.constant -1.000000e+00 : f32
    %16 = vector.shape_cast %15 : vector<1x128xi1> to vector<1x128xi1>
    %17 = vector.broadcast %16 : vector<1x128xi1> to vector<32x128xi1>
    %18 = vector.broadcast %cst_8 : f32 to vector<32x128xf32>
    %19 = arith.select %17, %12, %18 : vector<32x128xi1>, vector<32x128xf32>
    %20 = arith.maximumf %11, %19 : vector<32x128xf32>
    %21 = vector.extract_strided_slice %2 {offsets = [0, 256], sizes = [32, 128], strides = [1, 1]} : vector<32x1024xf32> to vector<32x128xf32>
    %22 = vector.extract_strided_slice %3 {offsets = [2, 0], sizes = [1, 128], strides = [1, 1]} : vector<8x128xf32> to vector<1x128xf32>
    %cst_9 = arith.constant 0.000000e+00 : f32
    %23 = vector.broadcast %cst_9 : f32 to vector<1x128xf32>
    %24 = arith.cmpf ogt, %22, %23 : vector<1x128xf32>
    %cst_10 = arith.constant -1.000000e+00 : f32
    %25 = vector.shape_cast %24 : vector<1x128xi1> to vector<1x128xi1>
    %26 = vector.broadcast %25 : vector<1x128xi1> to vector<32x128xi1>
    %27 = vector.broadcast %cst_10 : f32 to vector<32x128xf32>
    %28 = arith.select %26, %21, %27 : vector<32x128xi1>, vector<32x128xf32>
    %29 = arith.maximumf %20, %28 : vector<32x128xf32>
    %30 = vector.extract_strided_slice %2 {offsets = [0, 384], sizes = [32, 128], strides = [1, 1]} : vector<32x1024xf32> to vector<32x128xf32>
    %31 = vector.extract_strided_slice %3 {offsets = [3, 0], sizes = [1, 128], strides = [1, 1]} : vector<8x128xf32> to vector<1x128xf32>
    %cst_11 = arith.constant 0.000000e+00 : f32
    %32 = vector.broadcast %cst_11 : f32 to vector<1x128xf32>
    %33 = arith.cmpf ogt, %31, %32 : vector<1x128xf32>
    %cst_12 = arith.constant -1.000000e+00 : f32
    %34 = vector.shape_cast %33 : vector<1x128xi1> to vector<1x128xi1>
    %35 = vector.broadcast %34 : vector<1x128xi1> to vector<32x128xi1>
    %36 = vector.broadcast %cst_12 : f32 to vector<32x128xf32>
    %37 = arith.select %35, %30, %36 : vector<32x128xi1>, vector<32x128xf32>
    %38 = arith.maximumf %29, %37 : vector<32x128xf32>
    %39 = vector.extract_strided_slice %2 {offsets = [0, 512], sizes = [32, 128], strides = [1, 1]} : vector<32x1024xf32> to vector<32x128xf32>
    %40 = vector.extract_strided_slice %3 {offsets = [4, 0], sizes = [1, 128], strides = [1, 1]} : vector<8x128xf32> to vector<1x128xf32>
    %cst_13 = arith.constant 0.000000e+00 : f32
    %41 = vector.broadcast %cst_13 : f32 to vector<1x128xf32>
    %42 = arith.cmpf ogt, %40, %41 : vector<1x128xf32>
    %cst_14 = arith.constant -1.000000e+00 : f32
    %43 = vector.shape_cast %42 : vector<1x128xi1> to vector<1x128xi1>
    %44 = vector.broadcast %43 : vector<1x128xi1> to vector<32x128xi1>
    %45 = vector.broadcast %cst_14 : f32 to vector<32x128xf32>
    %46 = arith.select %44, %39, %45 : vector<32x128xi1>, vector<32x128xf32>
    %47 = arith.maximumf %38, %46 : vector<32x128xf32>
    %48 = vector.extract_strided_slice %2 {offsets = [0, 640], sizes = [32, 128], strides = [1, 1]} : vector<32x1024xf32> to vector<32x128xf32>
    %49 = vector.extract_strided_slice %3 {offsets = [5, 0], sizes = [1, 128], strides = [1, 1]} : vector<8x128xf32> to vector<1x128xf32>
    %cst_15 = arith.constant 0.000000e+00 : f32
    %50 = vector.broadcast %cst_15 : f32 to vector<1x128xf32>
    %51 = arith.cmpf ogt, %49, %50 : vector<1x128xf32>
    %cst_16 = arith.constant -1.000000e+00 : f32
    %52 = vector.shape_cast %51 : vector<1x128xi1> to vector<1x128xi1>
    %53 = vector.broadcast %52 : vector<1x128xi1> to vector<32x128xi1>
    %54 = vector.broadcast %cst_16 : f32 to vector<32x128xf32>
    %55 = arith.select %53, %48, %54 : vector<32x128xi1>, vector<32x128xf32>
    %56 = arith.maximumf %47, %55 : vector<32x128xf32>
    %57 = vector.extract_strided_slice %2 {offsets = [0, 768], sizes = [32, 128], strides = [1, 1]} : vector<32x1024xf32> to vector<32x128xf32>
    %58 = vector.extract_strided_slice %3 {offsets = [6, 0], sizes = [1, 128], strides = [1, 1]} : vector<8x128xf32> to vector<1x128xf32>
    %cst_17 = arith.constant 0.000000e+00 : f32
    %59 = vector.broadcast %cst_17 : f32 to vector<1x128xf32>
    %60 = arith.cmpf ogt, %58, %59 : vector<1x128xf32>
    %cst_18 = arith.constant -1.000000e+00 : f32
    %61 = vector.shape_cast %60 : vector<1x128xi1> to vector<1x128xi1>
    %62 = vector.broadcast %61 : vector<1x128xi1> to vector<32x128xi1>
    %63 = vector.broadcast %cst_18 : f32 to vector<32x128xf32>
    %64 = arith.select %62, %57, %63 : vector<32x128xi1>, vector<32x128xf32>
    %65 = arith.maximumf %56, %64 : vector<32x128xf32>
    %66 = vector.extract_strided_slice %2 {offsets = [0, 896], sizes = [32, 128], strides = [1, 1]} : vector<32x1024xf32> to vector<32x128xf32>
    %67 = vector.extract_strided_slice %3 {offsets = [7, 0], sizes = [1, 128], strides = [1, 1]} : vector<8x128xf32> to vector<1x128xf32>
    %cst_19 = arith.constant 0.000000e+00 : f32
    %68 = vector.broadcast %cst_19 : f32 to vector<1x128xf32>
    %69 = arith.cmpf ogt, %67, %68 : vector<1x128xf32>
    %cst_20 = arith.constant -1.000000e+00 : f32
    %70 = vector.shape_cast %69 : vector<1x128xi1> to vector<1x128xi1>
    %71 = vector.broadcast %70 : vector<1x128xi1> to vector<32x128xi1>
    %72 = vector.broadcast %cst_20 : f32 to vector<32x128xf32>
    %73 = arith.select %71, %66, %72 : vector<32x128xi1>, vector<32x128xf32>
    %74 = arith.maximumf %65, %73 : vector<32x128xf32>
    %c0_21 = arith.constant 0 : index
    %c0_22 = arith.constant 0 : index
    %75 = vector.load %arg5[%c0_21, %c0_22] : memref<32x1xf32, #tpu.memory_space<vmem>>, vector<32x1xf32>
    %cst_23 = arith.constant 0.000000e+00 : f32
    %76 = vector.broadcast %cst_23 : f32 to vector<32x1xf32>
    %77 = arith.cmpf ogt, %75, %76 : vector<32x1xf32>
    %cst_24 = arith.constant -1.000000e+00 : f32
    %78 = vector.shape_cast %77 : vector<32x1xi1> to vector<32x1xi1>
    %79 = vector.broadcast %78 : vector<32x1xi1> to vector<32x128xi1>
    %80 = vector.broadcast %cst_24 : f32 to vector<32x128xf32>
    %81 = arith.select %79, %74, %80 : vector<32x128xi1>, vector<32x128xf32>
    %c0_25 = arith.constant 0 : index
    %c0_26 = arith.constant 0 : index
    %82 = vector.load %arg6[%c0_25, %c0_26] : memref<32x128xf32, #tpu.memory_space<vmem>>, vector<32x128xf32>
    tpu.vector_store %arg6[%c0_25, %c0_26], %81 {strides = array<i32>} : memref<32x128xf32, #tpu.memory_space<vmem>>, vector<32x128xf32>,
    return
  }
  func.func @transform_0(%arg0: i32, %arg1: i32) -> (i32, i32) {
    %c0_i32 = arith.constant 0 : i32
    %c0_i32_0 = arith.constant 0 : i32
    return %arg0, %c0_i32 : i32, i32
  }
  func.func @transform_1(%arg0: i32, %arg1: i32) -> (i32, i32) {
    %c0_i32 = arith.constant 0 : i32
    %c0_i32_0 = arith.constant 0 : i32
    return %c0_i32, %arg1 : i32, i32
  }
  func.func @transform_2(%arg0: i32, %arg1: i32) -> (i32, i32) {
    %c0_i32 = arith.constant 0 : i32
    %c0_i32_0 = arith.constant 0 : i32
    return %c0_i32, %arg1 : i32, i32
  }
  func.func @transform_3(%arg0: i32, %arg1: i32) -> (i32, i32) {
    %c0_i32 = arith.constant 0 : i32
    %c0_i32_0 = arith.constant 0 : i32
    return %arg0, %c0_i32 : i32, i32
  }
  func.func @transform_4(%arg0: i32, %arg1: i32) -> (i32, i32) {
    %c0_i32 = arith.constant 0 : i32
    return %arg0, %arg1 : i32, i32
  }
}

</mosaic_0001>

<bundles_post_ra>
// kernel: tpu_custom_call.1
= control target key start
LH: loop header
LB: loop body
LE: loop exit
PB: predicated region body
PF: predicated region fallthrough
CT: control target
= control target key end

     0   :  { %9 = vsyncpa [#allocation3], 0  ;;  %s795_s0 = inlined_call_operand.vmem [shape: bf16[32,32], index: 0, kind: input, shape index: {}]   ;;  %s796_s1 = inlined_call_operand.hbm [shape: bf16[32,1024], index: 1, kind: input, shape index: {}]   ;;  %s797_s2 = inlined_call_operand.vmem [shape: f32[8,128], index: 2, kind: input, shape index: {}]   ;;  %s798_s3 = inlined_call_operand.vmem [shape: f32[32,1], index: 3, kind: input, shape index: {}]   ;;  %s799_s4 = inlined_call_operand.hbm [shape: f32[32,128], index: 4, kind: output, shape index: {}]  }
   0x1   :  { %10 = vsyncpa [#allocation4], 0  ;;  %s17_s17 = sshll.u32 %s796_s1, 4  ;;  %s605_s18 = smov [#allocation2]   ;;  %s18_s17 = int_to_ptr.hbm [resolvable:$true] %s17_s17 }
   0x2   :  { %s19_s19 = sshll.u32 %s605_s18, 4  ;;  %s606_s20 = smov 512   ;;  %s20_s19 = int_to_ptr.vmem [resolvable:$true] %s19_s19 }
   0x3   :  { %s607_s21 = smov 32  }
   0x4   :  { %25 = dma.hbm_to_vmem [thread:$0]  %s18_s17, 2048, %s20_s19, [#allocation3], %s606_s20, %s606_s20, %s607_s21  }
   0x5   :  { %601 = dma.done.wait [#allocation3], 2048  }
   0x6   :  { %602 = vsyncadd [#allocation3], 4294965248  ;;  %v480_v0 = vld [vmem:[#allocation2 + $0x40] sm:$0xf]  ;;  %v536_v2 = vld [vmem:[#allocation2 + $0x44] sm:$0xf] }
   0x7   :  { %v540_v1 = vld [vmem:[#allocation2 + $0x5c] sm:$0xf0]  ;;  %v482_v4 = vld [vmem:[#allocation2 + $0x60] sm:$0xf0]  ;;  %v488_v5 = vld [vmem:[#allocation2 + $0x48] sm:$0xf] }
   0x8   :  { %v481_v3 = vor.u32 %v540_v1, %v480_v0  ;;  %v541_v6 = vld [vmem:[#allocation2 + $0x64] sm:$0xf0]  ;;  %v485_v7 = vor.u32 %v536_v2, %v482_v4  ;;  %v537_v9 = vld [vmem:[#allocation2 + $0x4c] sm:$0xf]  ;;  %v448_v11 = vld [vmem:[#allocation2] sm:$0xf] }
   0x9   :  { %v489_v8 = vor.u32 %v541_v6, %v488_v5  ;;  %v490_v10 = vld [vmem:[#allocation2 + $0x68] sm:$0xf0]  ;;  %v532_v13 = vld [vmem:[#allocation2 + $0x1c] sm:$0xf0]  ;;  %v528_v14 = vld [vmem:[#allocation2 + $0x4] sm:$0xf] }
   0xa   :  { %158 = vmatpush.bf16.msra.mxu0 %v481_v3  ;;  %v493_v12 = vor.u32 %v537_v9, %v490_v10  ;;  %v450_v15 = vld [vmem:[#allocation2 + $0x20] sm:$0xf0]  ;;  %177 = vmatpush.bf16.msra.mxu1 %v485_v7  ;;  %v449_v16 = vor.u32 %v532_v13, %v448_v11  ;;  %v456_v18 = vld [vmem:[#allocation2 + $0x8] sm:$0xf]  ;;  %v529_v20 = vld [vmem:[#allocation2 + $0xc] sm:$0xf] }
   0xb   :  { %196 = vmatpush.bf16.msra.mxu2 %v489_v8  ;;  %v453_v17 = vor.u32 %v528_v14, %v450_v15  ;;  %v533_v19 = vld [vmem:[#allocation2 + $0x24] sm:$0xf0]  ;;  %v458_v22 = vld [vmem:[#allocation2 + $0x28] sm:$0xf0]  ;;  %v643_v23 = vld [vmem:[%s795_s0] sm:$0xff]  ;;  %vm145_vm0 = vcmask 261120  }
   0xc   :  { %215 = vmatpush.bf16.msra.mxu3 %v493_v12  ;;  %v457_v21 = vor.u32 %v533_v19, %v456_v18  ;;  %v504_v24 = vld [vmem:[#allocation2 + $0x58] sm:$0xf]  ;;  %v461_v25 = vor.u32 %v529_v20, %v458_v22  ;;  %v496_v27 = vld [vmem:[#allocation2 + $0x50] sm:$0xf]  ;;  %v539_v30 = vld [vmem:[#allocation2 + $0x5c] sm:$0xf] }
   0xd   :  { %v543_v26 = vld [vmem:[#allocation2 + $0x74] sm:$0xf0]  ;;  %v542_v28 = vld [vmem:[#allocation2 + $0x6c] sm:$0xf0]  ;;  %v506_v31 = vld [vmem:[#allocation2 + $0x78] sm:$0xf0] }
   0xe   :  { %159 = vmatpush.bf16.msra.mxu0 %v449_v16  ;;  %v505_v29 = vor.u32 %v543_v26, %v504_v24  ;;  %v538_v32 = vld [vmem:[#allocation2 + $0x54] sm:$0xf]  ;;  %178 = vmatpush.bf16.msra.mxu1 %v453_v17  ;;  %v497_v33 = vor.u32 %v542_v28, %v496_v27  ;;  %v509_v34 = vor.u32 %v539_v30, %v506_v31  ;;  %v472_v36 = vld [vmem:[#allocation2 + $0x18] sm:$0xf]  ;;  %v464_v39 = vld [vmem:[#allocation2 + $0x10] sm:$0xf] }
   0xf   :  { %197 = vmatpush.bf16.msra.mxu2 %v457_v21  ;;  %v498_v35 = vld [vmem:[#allocation2 + $0x70] sm:$0xf0]  ;;  %v535_v38 = vld [vmem:[#allocation2 + $0x34] sm:$0xf0]  ;;  %v534_v40 = vld [vmem:[#allocation2 + $0x2c] sm:$0xf0] }
  0x10   :  { %216 = vmatpush.bf16.msra.mxu3 %v461_v25  ;;  %v501_v37 = vor.u32 %v538_v32, %v498_v35  ;;  %v473_v41 = vor.u32 %v535_v38, %v472_v36  ;;  %v531_v42 = vld [vmem:[#allocation2 + $0x1c] sm:$0xf]  ;;  %v530_v44 = vld [vmem:[#allocation2 + $0x14] sm:$0xf]  ;;  %v465_v47 = vor.u32 %v534_v40, %v464_v39  ;;  %v527_v49 = vld [vmem:[%s795_s0 + $0x8] sm:$0xff]  ;;  %v608_v52 = vmov 0  }
  0x11   :  { %510 = vmatmul.msk.bf16.vlgmr.msra.gmra.mxu0 %vm145_vm0, %v643_v23  ;;  %v474_v43 = vld [vmem:[#allocation2 + $0x38] sm:$0xf0]  ;;  %512 = vmatmul.msk.bf16.vlgmr.msra.gmra.mxu1 %vm145_vm0, %v643_v23  ;;  %v466_v46 = vld [vmem:[#allocation2 + $0x30] sm:$0xf0]  ;;  %v383_v50 = vld [vmem:[%s798_s3] sm:$0xff]  ;;  %s425_s10 = sshll.u32 %s799_s4, 4  ;;  %s426_s10 = int_to_ptr.hbm [resolvable:$true] %s425_s10 }
  0x12   :  { %514 = vmatmul.msk.bf16.vlgmr.msra.gmra.mxu2 %vm145_vm0, %v643_v23  ;;  %v477_v45 = vor.u32 %v531_v42, %v474_v43  ;;  %234 = vmatpush.bf16.msrb.mxu0 %v497_v33  ;;  %v469_v48 = vor.u32 %v530_v44, %v466_v46  ;;  %v385_v51 = vld [vmem:[%s798_s3 + $0x10] sm:$0xff]  ;;  %vm387_vm1 = vcmp.gt.f32.partialorder %v383_v50, 0.0  ;;  %v384_v55 = vld [vmem:[%s798_s3 + $0x8] sm:$0xff]  ;;  %v386_v56 = vld [vmem:[%s798_s3 + $0x18] sm:$0xff]  ;;  %s610_s11 = smov 128   ;;  %s611_s12 = smov 8  }
  0x13   :  { %272 = vmatpush.bf16.msrb.mxu2 %v505_v29  ;;  %516 = vmatmul.msk.bf16.vlgmr.msra.gmra.mxu3 %vm145_vm0, %v643_v23  ;;  %vm389_vm2 = vcmp.gt.f32.partialorder %v385_v51, 0.0  ;;  %v391_v53 = vsel %vm387_vm1, 1, %v608_v52  ;;  %vm388_vm3 = vcmp.gt.f32.partialorder %v384_v55, 0.0  ;;  %vm390_vm4 = vcmp.gt.f32.partialorder %v386_v56, 0.0  ;;  %v304_v62 = vld [vmem:[%s797_s2] sm:$0xff]  ;;  %s609_s2 = smov [#allocation5]  }
  0x14   :  { %291 = vmatpush.bf16.msrb.mxu3 %v509_v34  ;;  %253 = vmatpush.bf16.msrb.mxu1 %v501_v37  ;;  %v393_v54 = vsel %vm389_vm2, 1, %v608_v52  ;;  %v392_v57 = vsel %vm388_vm3, 1, %v608_v52  ;;  %v394_v58 = vsel %vm390_vm4, 1, %v608_v52  ;;  %vm305_vm5 = vcmp.gt.f32.partialorder %v304_v62, 0.0  ;;  %s423_s7 = sshll.u32 %s609_s2, 4  ;;  %s424_s7 = int_to_ptr.vmem [resolvable:$true] %s423_s7 }
  0x15   :  { %551 = vset.pattern.permute.xlu0 %v608_v52  ;;  %552 = vset.pattern.permute.xlu1 %v608_v52  ;;  %v306_v2 = vsel %vm305_vm5, 1, %v608_v52 }
  0x16   :  { %235 = vmatpush.bf16.msrb.mxu0 %v465_v47  ;;  %396 = vperm.xlu0 %551, %v391_v53   ;;  %v307_v6 = vperm.slane %v306_v2, 0  ;;  %v313_v7 = vperm.slane %v306_v2, 1  ;;  %v323_v9 = vperm.slane %v306_v2, 2  ;;  %v333_v13 = vperm.slane %v306_v2, 3 }
  0x17   :  { %273 = vmatpush.bf16.msrb.mxu2 %v473_v41  ;;  %402 = vperm.xlu1 %552, %v393_v54   ;;  %v343_v21 = vperm.slane %v306_v2, 4  ;;  %v353_v25 = vperm.slane %v306_v2, 5  ;;  %v363_v37 = vperm.slane %v306_v2, 6  ;;  %v373_v39 = vperm.slane %v306_v2, 7 }
  0x18   :  { %292 = vmatpush.bf16.msrb.mxu3 %v477_v45  ;;  %254 = vmatpush.bf16.msrb.mxu1 %v469_v48  ;;  %vm687_vm6 = vcmp.eq.s32.totalorder %v307_v6, 1  ;;  %vm691_vm7 = vcmp.eq.s32.totalorder %v313_v7, 1  ;;  %vm695_vm8 = vcmp.eq.s32.totalorder %v323_v9, 1  ;;  %vm709_vm9 = vcmp.eq.s32.totalorder %v333_v13, 1 }
  0x19   :  { %vm715_vm10 = vcmp.eq.s32.totalorder %v343_v21, 1  ;;  %vm727_vm11 = vcmp.eq.s32.totalorder %v353_v25, 1  ;;  %vm735_vm12 = vcmp.eq.s32.totalorder %v363_v37, 1  ;;  %vm739_vm13 = vcmp.eq.s32.totalorder %v373_v39, 1 }
  0x1e   :  { %399 = vperm.xlu0 %551, %v392_v57  }
  0x1f   :  { %405 = vperm.xlu1 %552, %v394_v58  }
  0x21   :  { %511 = vmatmul.msk.bf16.gmra.mxu0 %vm145_vm0, %v527_v49  ;;  %513 = vmatmul.msk.bf16.gmra.mxu1 %vm145_vm0, %v527_v49 }
  0x22   :  { %515 = vmatmul.msk.bf16.gmra.mxu2 %vm145_vm0, %v527_v49 }
  0x23   :  { %517 = vmatmul.msk.bf16.gmra.mxu3 %vm145_vm0, %v527_v49 }
  0x31   :  { %518 = vmatmul.msk.bf16.vlgmr.msrb.gmra.mxu0 %vm145_vm0, %v643_v23  ;;  %520 = vmatmul.msk.bf16.vlgmr.msrb.gmra.mxu1 %vm145_vm0, %v643_v23 }
  0x32   :  { %522 = vmatmul.msk.bf16.vlgmr.msrb.gmra.mxu2 %vm145_vm0, %v643_v23 }
  0x33   :  { %524 = vmatmul.msk.bf16.vlgmr.msrb.gmra.mxu3 %vm145_vm0, %v643_v23 }
  0x41   :  { %519 = vmatmul.msk.bf16.gmra.mxu0 %vm145_vm0, %v527_v49  ;;  %521 = vmatmul.msk.bf16.gmra.mxu1 %vm145_vm0, %v527_v49 }
  0x42   :  { %523 = vmatmul.msk.bf16.gmra.mxu2 %vm145_vm0, %v527_v49 }
  0x43   :  { %525 = vmatmul.msk.bf16.gmra.mxu3 %vm145_vm0, %v527_v49 }
  0x88   :  { %v397_v45 = vpop.permute.xlu0 %396 }
  0x89   :  { %vm407_vm14 = vcmp.eq.s32.totalorder %v397_v45, 1 }
  0x8e   :  { %v161_v59 = vpop.f32.mrf.mxu0  ;;  %v180_v60 = vpop.f32.mrf.mxu1 }
  0x8f   :  { %v309_v15 = vsel %vm687_vm6, %v161_v59, -1.0  ;;  %v315_v16 = vsel %vm691_vm7, %v180_v60, -1.0 }
  0x90   :  { %v319_v22 = vmax.f32 %v309_v15, %v315_v16  ;;  %v400_v6 = vpop.permute.xlu0 %399 }
  0x91   :  { %vm408_vm15 = vcmp.eq.s32.totalorder %v400_v6, 1 }
  0x95   :  { %v199_v61 = vpop.f32.mrf.mxu2 }
  0x96   :  { %v218_v63 = vpop.f32.mrf.mxu3  ;;  %v163_v0 = vpop.f32.mrf.mxu0  ;;  %v325_v20 = vsel %vm695_vm8, %v199_v61, -1.0 }
  0x97   :  { %v182_v1 = vpop.f32.mrf.mxu1  ;;  %v329_v24 = vmax.f32 %v319_v22, %v325_v20  ;;  %v335_v26 = vsel %vm709_vm9, %v218_v63, -1.0  ;;  %v310_v29 = vsel %vm687_vm6, %v163_v0, -1.0 }
  0x98   :  { %v316_v30 = vsel %vm691_vm7, %v182_v1, -1.0 }
  0x99   :  { %v339_v33 = vmax.f32 %v329_v24, %v335_v26  ;;  %v320_v40 = vmax.f32 %v310_v29, %v316_v30  ;;  %v403_v29 = vpop.permute.xlu1 %402 }
  0x9a   :  { %vm409_vm0 = vcmp.eq.s32.totalorder %v403_v29, 1 }
  0x9d   :  { %v201_v3 = vpop.f32.mrf.mxu2 }
  0x9e   :  { %v220_v4 = vpop.f32.mrf.mxu3  ;;  %v166_v5 = vpop.f32.mrf.mxu0  ;;  %v326_v38 = vsel %vm695_vm8, %v201_v3, -1.0 }
  0x9f   :  { %v185_v8 = vpop.f32.mrf.mxu1  ;;  %v330_v43 = vmax.f32 %v320_v40, %v326_v38  ;;  %v336_v49 = vsel %vm709_vm9, %v220_v4, -1.0  ;;  %v311_v50 = vsel %vm687_vm6, %v166_v5, -1.0 }
  0xa0   :  { %v317_v51 = vsel %vm691_vm7, %v185_v8, -1.0 }
  0xa1   :  { %v340_v55 = vmax.f32 %v330_v43, %v336_v49  ;;  %v321_v61 = vmax.f32 %v311_v50, %v317_v51  ;;  %v406_v27 = vpop.permute.xlu1 %405 }
  0xa2   :  { %vm410_vm1 = vcmp.eq.s32.totalorder %v406_v27, 1 }
  0xa5   :  { %v204_v14 = vpop.f32.mrf.mxu2 }
  0xa6   :  { %v223_v17 = vpop.f32.mrf.mxu3  ;;  %v703_v18 = vpop.f32.mrf.mxu0  ;;  %v327_v60 = vsel %vm695_vm8, %v204_v14, -1.0 }
  0xa7   :  { %v705_v19 = vpop.f32.mrf.mxu1  ;;  %v331_v0 = vmax.f32 %v321_v61, %v327_v60  ;;  %v337_v2 = vsel %vm709_vm9, %v223_v17, -1.0  ;;  %v312_v7 = vsel %vm687_vm6, %v703_v18, -1.0 }
  0xa8   :  { %v318_v8 = vsel %vm691_vm7, %v705_v19, -1.0 }
  0xa9   :  { %v341_v15 = vmax.f32 %v331_v0, %v337_v2  ;;  %v322_v11 = vmax.f32 %v312_v7, %v318_v8 }
  0xad   :  { %v206_v28 = vpop.f32.mrf.mxu2 }
  0xae   :  { %v723_v31 = vpop.f32.mrf.mxu3  ;;  %v237_v32 = vpop.f32.mrf.mxu0  ;;  %v328_v21 = vsel %vm695_vm8, %v206_v28, -1.0 }
  0xaf   :  { %v345_v34 = vsel %vm715_vm10, %v237_v32, -1.0  ;;  %v256_v35 = vpop.f32.mrf.mxu1  ;;  %v332_v24 = vmax.f32 %v322_v11, %v328_v21  ;;  %v338_v12 = vsel %vm709_vm9, %v723_v31, -1.0 }
  0xb0   :  { %v349_v41 = vmax.f32 %v339_v33, %v345_v34  ;;  %v355_v42 = vsel %vm727_vm11, %v256_v35, -1.0 }
  0xb1   :  { %v342_v34 = vmax.f32 %v332_v24, %v338_v12 }
  0xb2   :  { %v359_v47 = vmax.f32 %v349_v41, %v355_v42 }
  0xb5   :  { %v275_v48 = vpop.f32.mrf.mxu2 }
  0xb6   :  { %v365_v52 = vsel %vm735_vm12, %v275_v48, -1.0  ;;  %v294_v53 = vpop.f32.mrf.mxu3  ;;  %v239_v54 = vpop.f32.mrf.mxu0 }
  0xb7   :  { %v369_v56 = vmax.f32 %v359_v47, %v365_v52  ;;  %v375_v57 = vsel %vm739_vm13, %v294_v53, -1.0  ;;  %v346_v58 = vsel %vm715_vm10, %v239_v54, -1.0  ;;  %v258_v59 = vpop.f32.mrf.mxu1 }
  0xb8   :  { %v350_v63 = vmax.f32 %v340_v55, %v346_v58  ;;  %v356_v3 = vsel %vm727_vm11, %v258_v59, -1.0 }
  0xb9   :  { %v379_v62 = vmax.f32 %v369_v56, %v375_v57 }
  0xba   :  { %v360_v4 = vmax.f32 %v350_v63, %v356_v3 }
  0xbb   :  { %v411_v1 = vsel %vm407_vm14, %v379_v62, -1.0 }
  0xbc   :  { %415 = vst [vmem:[#allocation5] sm:$0xff] %v411_v1 }
  0xbd   :  { %v277_v5 = vpop.f32.mrf.mxu2 }
  0xbe   :  { %v366_v9 = vsel %vm735_vm12, %v277_v5, -1.0  ;;  %v296_v13 = vpop.f32.mrf.mxu3  ;;  %v242_v14 = vpop.f32.mrf.mxu0 }
  0xbf   :  { %v370_v16 = vmax.f32 %v360_v4, %v366_v9  ;;  %v347_v17 = vsel %vm715_vm10, %v242_v14, -1.0  ;;  %v261_v20 = vpop.f32.mrf.mxu1  ;;  %v376_v10 = vsel %vm739_vm13, %v296_v13, -1.0 }
  0xc0   :  { %v351_v19 = vmax.f32 %v341_v15, %v347_v17  ;;  %v357_v22 = vsel %vm727_vm11, %v261_v20, -1.0 }
  0xc1   :  { %v380_v18 = vmax.f32 %v370_v16, %v376_v10 }
  0xc2   :  { %v361_v26 = vmax.f32 %v351_v19, %v357_v22 }
  0xc3   :  { %v412_v25 = vsel %vm408_vm15, %v380_v18, -1.0 }
  0xc4   :  { %416 = vst [vmem:[#allocation5 + $0x8] sm:$0xff] %v412_v25 }
  0xc5   :  { %v280_v30 = vpop.f32.mrf.mxu2 }
  0xc6   :  { %v367_v28 = vsel %vm735_vm12, %v280_v30, -1.0  ;;  %v299_v32 = vpop.f32.mrf.mxu3  ;;  %v244_v33 = vpop.f32.mrf.mxu0 }
  0xc7   :  { %v371_v35 = vmax.f32 %v361_v26, %v367_v28  ;;  %v377_v37 = vsel %vm739_vm13, %v299_v32, -1.0  ;;  %v348_v38 = vsel %vm715_vm10, %v244_v33, -1.0  ;;  %v263_v41 = vpop.f32.mrf.mxu1 }
  0xc8   :  { %v352_v40 = vmax.f32 %v342_v34, %v348_v38  ;;  %v358_v23 = vsel %vm727_vm11, %v263_v41, -1.0 }
  0xc9   :  { %v381_v39 = vmax.f32 %v371_v35, %v377_v37 }
  0xca   :  { %v362_v31 = vmax.f32 %v352_v40, %v358_v23 }
  0xcb   :  { %v413_v42 = vsel %vm409_vm0, %v381_v39, -1.0 }
  0xcc   :  { %417 = vst [vmem:[#allocation5 + $0x10] sm:$0xff] %v413_v42 }
  0xcd   :  { %v282_v43 = vpop.f32.mrf.mxu2 }
  0xce   :  { %v368_v45 = vsel %vm735_vm12, %v282_v43, -1.0  ;;  %v301_v47 = vpop.f32.mrf.mxu3 }
  0xcf   :  { %v372_v48 = vmax.f32 %v362_v31, %v368_v45  ;;  %v378_v49 = vsel %vm739_vm13, %v301_v47, -1.0 }
  0xd1   :  { %v382_v50 = vmax.f32 %v372_v48, %v378_v49 }
  0xd3   :  { %v414_v36 = vsel %vm410_vm1, %v382_v50, -1.0 }
  0xd4   :  { %418 = vst [vmem:[#allocation5 + $0x18] sm:$0xff] %v414_v36 }
  0xd5   :  { %431 = dma.vmem_to_hbm [thread:$0]  %s424_s7, 512, %s426_s10, [#allocation4], %s610_s11, %s610_s11, %s611_s12  }
  0xd6   :  { %603 = dma.done.wait [#allocation4], 512  }
  0xd7   :  { %604 = vsyncadd [#allocation4], 4294966784 }
  0xd8   :  { %436 = vsyncpa [#allocation3], 1 }
  0xd9   :  { %437 = vsyncpa [#allocation4], 1 }

</bundles_post_ra>
